<compile_context>
chip_gen: v7x
topology: tpu7x:2x2x1
jax: 0.10.0
libtpu: 0.0.40
codegen_flags: <defaults>
</compile_context>

<pallas_src>
import jax
import jax.numpy as jnp
from jax.experimental import pallas as pl
from jax.experimental.pallas import tpu as pltpu

_LANES = 128              # vreg lane width
_SUBLANES = 8             # vreg sublane count
_MAX_BLOCK_ROWS = 1024    # 1024*128*4B = 0.5 MiB per block/buffer


def _propagate_path(p_lb, p_ub):
    """Elementwise DeepPoly propagation of the path half: Dummy -> ReLU -> ReLU6.

    Pure jnp; used both inside the Pallas kernel and by the pure-JAX reference.
    """
    one = jnp.ones_like(p_lb)
    zero = jnp.zeros_like(p_lb)

    # ---- VerifyDummy: identity on the bounds ----

    # ---- VerifyReLU (alpha='seesaw') ----
    den_r = p_ub - p_lb
    inv_r = 1.0 / jnp.where(den_r == 0.0, one, den_r)      # guard point intervals
    slope = jnp.maximum(p_ub * inv_r, 0.0)
    # alpha = (ub > -lb) in {0,1}; clip(alpha,0,1) is a no-op; diag(lc) selects lb or 0.
    lb1 = jnp.where((p_ub >= 0.0) & (p_ub > -p_lb), p_lb, zero)
    ub1 = jnp.where(p_lb > 0.0, p_ub, slope * den_r)

    # ---- VerifyReLU6 (alpha='seesaw', beta='seesaw_beta') ----
    den6 = ub1 - lb1
    inv6 = 1.0 / jnp.where(den6 == 0.0, one, den6)          # guard dead-ReLU / point intervals
    upper_slope = jnp.clip(ub1 * inv6, 0.0, 1.0)
    lower_slope = jnp.clip((6.0 - lb1) * inv6, 0.0, 1.0)
    max_alphas = jnp.minimum(one, jnp.maximum(6.0 / ub1, 0.0))
    max_betas = jnp.minimum(one, 6.0 / (6.0 - lb1))
    # alpha6/beta6 are exact {0,1} at 'seesaw' init, so clip(a, 0, max) == where(a, max, 0)
    ca = jnp.where(ub1 > -lb1, max_alphas, zero)
    cb = jnp.where((6.0 - lb1) > (ub1 - 6.0), max_betas, zero)

    lc6 = jnp.where(lb1 > 0.0,
                    jnp.where(ub1 < 6.0, one, lower_slope),
                    jnp.where(ub1 < 0.0, zero, ca))
    uc6 = jnp.where(ub1 < 6.0,
                    jnp.where(lb1 > 0.0, one, upper_slope),
                    jnp.where(lb1 > 6.0, zero, cb))
    uc6_bias = jnp.where(ub1 < 6.0,
                         jnp.where(lb1 > 0.0, zero, -(upper_slope * lb1)),
                         jnp.where(lb1 > 6.0, 6.0 * one, 6.0 * (one - cb)))
    lc6_bias = jnp.where(ub1 > 6.0,
                         jnp.where(lb1 > 0.0, 6.0 - lower_slope * ub1, zero),
                         zero)

    lb2 = lb1 * lc6 + lc6_bias
    ub2 = ub1 * uc6 + uc6_bias
    return lb2, ub2


def _skip_path_kernel(lb_ref, ub_ref, lb_out_ref, ub_out_ref):
    # Each grid step sees one (block_rows, 128) slab of the PATH half only.
    lb2, ub2 = _propagate_path(lb_ref[...], ub_ref[...])
    lb_out_ref[...] = lb2
    ub_out_ref[...] = ub2


def _pick_block_rows(p_rows):
    """Largest sublane-aligned divisor of p_rows not exceeding _MAX_BLOCK_ROWS."""
    br = min(p_rows, _MAX_BLOCK_ROWS)
    while p_rows % br:            # p_rows is a multiple of 8 -> terminates (>= 8)
        br -= _SUBLANES
    return br


@jax.jit
def verify_skip_path_forward(lb, ub):
    """lb, ub: 1-D float32 arrays of length 2N, with N a multiple of 8*128 = 1024."""
    (two_n,) = lb.shape
    n_half = two_n // 2
    assert two_n == 2 * n_half and n_half % (_SUBLANES * _LANES) == 0, \
        "need N (= two_n // 2) to be a multiple of 1024"
    rows = two_n // _LANES        # full-sublane layout: (rows, 128)
    p_rows = n_half // _LANES     # rows belonging to the path half
    br = _pick_block_rows(p_rows)

    lb2d = lb.reshape(rows, _LANES)
    ub2d = ub.reshape(rows, _LANES)

    # The grid covers ONLY the path rows (blocks [0, p_rows//br)); the skip rows are
    # never DMA'd.  Outputs alias the inputs, so the untouched skip half is preserved
    # for free (classic write-back-into-aliased-buffer pattern).
    spec = pl.BlockSpec((br, _LANES), lambda i: (i, 0))
    lb_out, ub_out = pl.pallas_call(
        _skip_path_kernel,
        grid=(p_rows // br,),
        in_specs=[spec, spec],
        out_specs=(spec, spec),
        out_shape=(
            jax.ShapeDtypeStruct((rows, _LANES), lb.dtype),
            jax.ShapeDtypeStruct((rows, _LANES), ub.dtype),
        ),
        input_output_aliases={0: 0, 1: 1},
        compiler_params=pltpu.CompilerParams(
            dimension_semantics=("parallel",),          # shards across v7x's 2 TCs
            vmem_limit_bytes=32 * 1024 * 1024),
    )(lb2d, ub2d)
    return lb_out.reshape(two_n), ub_out.reshape(two_n)


def _reference_forward(lb, ub):
    """Pure-JAX reference (no Pallas): split, propagate path, re-concat with skip."""
    n = lb.shape[0] // 2
    lb2, ub2 = _propagate_path(lb[:n], ub[:n])
    return jnp.concatenate([lb2, lb[n:]]), jnp.concatenate([ub2, ub[n:]])


if __name__ == "__main__":
    N_HALF = 1024            # neurons in each half of the skip block (8 full vreg rows)
    TWO_N = 2 * N_HALF       # total bound-vector length

    key = jax.random.PRNGKey(0)
    k1, k2 = jax.random.split(key)
    # Bounds with lb < ub spanning ALL regimes: dead ReLU (ub < 0), crossing 0,
    # crossing 6, and saturated (lb > 6) — exercises the NaN-guarded denominators.
    center = jax.random.uniform(k1, (TWO_N,), jnp.float32, minval=-3.0, maxval=9.0)
    half = jax.random.uniform(k2, (TWO_N,), jnp.float32, minval=0.1, maxval=3.0)
    lb = center - half
    ub = center + half

    # Compute the pure-JAX reference first (kernel outputs alias/donate their operands).
    lb_ref, ub_ref = _reference_forward(lb, ub)

    lb_out, ub_out = verify_skip_path_forward(lb, ub)
    jax.block_until_ready((lb_out, ub_out))

    assert jnp.allclose(lb_out, lb_ref, rtol=1e-6, atol=1e-5)
    assert jnp.allclose(ub_out, ub_ref, rtol=1e-6, atol=1e-5)
    # No NaN/inf even for dead-ReLU / degenerate intervals, and bounds stay sound.
    assert bool(jnp.all(jnp.isfinite(lb_out))) and bool(jnp.all(jnp.isfinite(ub_out)))
    assert bool(jnp.all(ub_out >= lb_out))

    print("KERNEL_OK")
</pallas_src>

<mosaic_0001>
module attributes {stable_mosaic.version = 11 : i64} {
  func.func @_skip_path_kernel(%arg0: i32, %arg1: memref<8x128xf32, #tpu.memory_space<vmem>>, %arg2: memref<8x128xf32, #tpu.memory_space<vmem>>, %arg3: memref<8x128xf32, #tpu.memory_space<vmem>>, %arg4: memref<8x128xf32, #tpu.memory_space<vmem>>) attributes {dimension_semantics = [#tpu.dimension_semantics<parallel>], iteration_bounds = array<i64: 1>, scalar_prefetch = 0 : i64, scratch_operands = 0 : i64, tpu.core_type = #tpu.core_type<tc>, window_params = [{transform_indices = @transform_0, window_bounds = array<i64: 8, 128>}, {transform_indices = @transform_1, window_bounds = array<i64: 8, 128>}, {transform_indices = @transform_2, window_bounds = array<i64: 8, 128>}, {transform_indices = @transform_3, window_bounds = array<i64: 8, 128>}]} {
    %c0 = arith.constant 0 : index
    %c0_0 = arith.constant 0 : index
    %0 = vector.load %arg1[%c0, %c0_0] : memref<8x128xf32, #tpu.memory_space<vmem>>, vector<8x128xf32>
    %c0_1 = arith.constant 0 : index
    %c0_2 = arith.constant 0 : index
    %1 = vector.load %arg2[%c0_1, %c0_2] : memref<8x128xf32, #tpu.memory_space<vmem>>, vector<8x128xf32>
    %cst = arith.constant 1.000000e+00 : f32
    %2 = vector.broadcast %cst : f32 to vector<8x128xf32>
    %cst_3 = arith.constant 0.000000e+00 : f32
    %3 = vector.broadcast %cst_3 : f32 to vector<8x128xf32>
    %4 = arith.subf %1, %0 : vector<8x128xf32>
    %cst_4 = arith.constant 0.000000e+00 : f32
    %5 = vector.broadcast %cst_4 : f32 to vector<8x128xf32>
    %6 = arith.cmpf oeq, %4, %5 : vector<8x128xf32>
    %7 = arith.select %6, %2, %4 : vector<8x128xi1>, vector<8x128xf32>
    %cst_5 = arith.constant 1.000000e+00 : f32
    %8 = vector.broadcast %cst_5 : f32 to vector<8x128xf32>
    %9 = arith.divf %8, %7 : vector<8x128xf32>
    %10 = arith.mulf %1, %9 : vector<8x128xf32>
    %cst_6 = arith.constant 0.000000e+00 : f32
    %11 = vector.broadcast %cst_6 : f32 to vector<8x128xf32>
    %12 = arith.maximumf %10, %11 : vector<8x128xf32>
    %cst_7 = arith.constant 0.000000e+00 : f32
    %13 = vector.broadcast %cst_7 : f32 to vector<8x128xf32>
    %14 = arith.cmpf oge, %1, %13 : vector<8x128xf32>
    %cst_8 = arith.constant 0.000000e+00 : f32
    %15 = vector.broadcast %cst_8 : f32 to vector<8x128xf32>
    %16 = arith.subf %15, %0 : vector<8x128xf32>
    %17 = arith.cmpf ogt, %1, %16 : vector<8x128xf32>
    %18 = arith.andi %14, %17 : vector<8x128xi1>
    %19 = arith.select %18, %0, %3 : vector<8x128xi1>, vector<8x128xf32>
    %cst_9 = arith.constant 0.000000e+00 : f32
    %20 = vector.broadcast %cst_9 : f32 to vector<8x128xf32>
    %21 = arith.cmpf ogt, %0, %20 : vector<8x128xf32>
    %22 = arith.mulf %12, %4 : vector<8x128xf32>
    %23 = arith.select %21, %1, %22 : vector<8x128xi1>, vector<8x128xf32>
    %24 = arith.subf %23, %19 : vector<8x128xf32>
    %cst_10 = arith.constant 0.000000e+00 : f32
    %25 = vector.broadcast %cst_10 : f32 to vector<8x128xf32>
    %26 = arith.cmpf oeq, %24, %25 : vector<8x128xf32>
    %27 = arith.select %26, %2, %24 : vector<8x128xi1>, vector<8x128xf32>
    %cst_11 = arith.constant 1.000000e+00 : f32
    %28 = vector.broadcast %cst_11 : f32 to vector<8x128xf32>
    %29 = arith.divf %28, %27 : vector<8x128xf32>
    %30 = arith.mulf %23, %29 : vector<8x128xf32>
    %cst_12 = arith.constant 0.000000e+00 : f32
    %cst_13 = arith.constant 1.000000e+00 : f32
    %31 = vector.broadcast %cst_12 : f32 to vector<8x128xf32>
    %32 = arith.maximumf %31, %30 : vector<8x128xf32>
    %33 = vector.broadcast %cst_13 : f32 to vector<8x128xf32>
    %34 = arith.minimumf %33, %32 : vector<8x128xf32>
    %cst_14 = arith.constant 6.000000e+00 : f32
    %35 = vector.broadcast %cst_14 : f32 to vector<8x128xf32>
    %36 = arith.subf %35, %19 : vector<8x128xf32>
    %37 = arith.mulf %36, %29 : vector<8x128xf32>
    %cst_15 = arith.constant 0.000000e+00 : f32
    %cst_16 = arith.constant 1.000000e+00 : f32
    %38 = vector.broadcast %cst_15 : f32 to vector<8x128xf32>
    %39 = arith.maximumf %38, %37 : vector<8x128xf32>
    %40 = vector.broadcast %cst_16 : f32 to vector<8x128xf32>
    %41 = arith.minimumf %40, %39 : vector<8x128xf32>
    %cst_17 = arith.constant 6.000000e+00 : f32
    %42 = vector.broadcast %cst_17 : f32 to vector<8x128xf32>
    %43 = arith.divf %42, %23 : vector<8x128xf32>
    %cst_18 = arith.constant 0.000000e+00 : f32
    %44 = vector.broadcast %cst_18 : f32 to vector<8x128xf32>
    %45 = arith.maximumf %43, %44 : vector<8x128xf32>
    %46 = arith.minimumf %2, %45 : vector<8x128xf32>
    %cst_19 = arith.constant 6.000000e+00 : f32
    %47 = vector.broadcast %cst_19 : f32 to vector<8x128xf32>
    %48 = arith.subf %47, %19 : vector<8x128xf32>
    %cst_20 = arith.constant 6.000000e+00 : f32
    %49 = vector.broadcast %cst_20 : f32 to vector<8x128xf32>
    %50 = arith.divf %49, %48 : vector<8x128xf32>
    %51 = arith.minimumf %2, %50 : vector<8x128xf32>
    %cst_21 = arith.constant 0.000000e+00 : f32
    %52 = vector.broadcast %cst_21 : f32 to vector<8x128xf32>
    %53 = arith.subf %52, %19 : vector<8x128xf32>
    %54 = arith.cmpf ogt, %23, %53 : vector<8x128xf32>
    %55 = arith.select %54, %46, %3 : vector<8x128xi1>, vector<8x128xf32>
    %cst_22 = arith.constant 6.000000e+00 : f32
    %56 = vector.broadcast %cst_22 : f32 to vector<8x128xf32>
    %57 = arith.subf %56, %19 : vector<8x128xf32>
    %cst_23 = arith.constant 6.000000e+00 : f32
    %58 = vector.broadcast %cst_23 : f32 to vector<8x128xf32>
    %59 = arith.subf %23, %58 : vector<8x128xf32>
    %60 = arith.cmpf ogt, %57, %59 : vector<8x128xf32>
    %61 = arith.select %60, %51, %3 : vector<8x128xi1>, vector<8x128xf32>
    %cst_24 = arith.constant 0.000000e+00 : f32
    %62 = vector.broadcast %cst_24 : f32 to vector<8x128xf32>
    %63 = arith.cmpf ogt, %19, %62 : vector<8x128xf32>
    %cst_25 = arith.constant 6.000000e+00 : f32
    %64 = vector.broadcast %cst_25 : f32 to vector<8x128xf32>
    %65 = arith.cmpf olt, %23, %64 : vector<8x128xf32>
    %66 = arith.select %65, %2, %41 : vector<8x128xi1>, vector<8x128xf32>
    %cst_26 = arith.constant 0.000000e+00 : f32
    %67 = vector.broadcast %cst_26 : f32 to vector<8x128xf32>
    %68 = arith.cmpf olt, %23, %67 : vector<8x128xf32>
    %69 = arith.select %68, %3, %55 : vector<8x128xi1>, vector<8x128xf32>
    %70 = arith.select %63, %66, %69 : vector<8x128xi1>, vector<8x128xf32>
    %cst_27 = arith.constant 6.000000e+00 : f32
    %71 = vector.broadcast %cst_27 : f32 to vector<8x128xf32>
    %72 = arith.cmpf olt, %23, %71 : vector<8x128xf32>
    %cst_28 = arith.constant 0.000000e+00 : f32
    %73 = vector.broadcast %cst_28 : f32 to vector<8x128xf32>
    %74 = arith.cmpf ogt, %19, %73 : vector<8x128xf32>
    %75 = arith.select %74, %2, %34 : vector<8x128xi1>, vector<8x128xf32>
    %cst_29 = arith.constant 6.000000e+00 : f32
    %76 = vector.broadcast %cst_29 : f32 to vector<8x128xf32>
    %77 = arith.cmpf ogt, %19, %76 : vector<8x128xf32>
    %78 = arith.select %77, %3, %61 : vector<8x128xi1>, vector<8x128xf32>
    %79 = arith.select %72, %75, %78 : vector<8x128xi1>, vector<8x128xf32>
    %cst_30 = arith.constant 6.000000e+00 : f32
    %80 = vector.broadcast %cst_30 : f32 to vector<8x128xf32>
    %81 = arith.cmpf olt, %23, %80 : vector<8x128xf32>
    %cst_31 = arith.constant 0.000000e+00 : f32
    %82 = vector.broadcast %cst_31 : f32 to vector<8x128xf32>
    %83 = arith.cmpf ogt, %19, %82 : vector<8x128xf32>
    %84 = arith.mulf %34, %19 : vector<8x128xf32>
    %cst_32 = arith.constant 0.000000e+00 : f32
    %85 = vector.broadcast %cst_32 : f32 to vector<8x128xf32>
    %86 = arith.subf %85, %84 : vector<8x128xf32>
    %87 = arith.select %83, %3, %86 : vector<8x128xi1>, vector<8x128xf32>
    %cst_33 = arith.constant 6.000000e+00 : f32
    %88 = vector.broadcast %cst_33 : f32 to vector<8x128xf32>
    %89 = arith.cmpf ogt, %19, %88 : vector<8x128xf32>
    %cst_34 = arith.constant 6.000000e+00 : f32
    %90 = vector.broadcast %cst_34 : f32 to vector<8x128xf32>
    %91 = arith.mulf %90, %2 : vector<8x128xf32>
    %92 = arith.subf %2, %61 : vector<8x128xf32>
    %cst_35 = arith.constant 6.000000e+00 : f32
    %93 = vector.broadcast %cst_35 : f32 to vector<8x128xf32>
    %94 = arith.mulf %93, %92 : vector<8x128xf32>
    %95 = arith.select %89, %91, %94 : vector<8x128xi1>, vector<8x128xf32>
    %96 = arith.select %81, %87, %95 : vector<8x128xi1>, vector<8x128xf32>
    %cst_36 = arith.constant 6.000000e+00 : f32
    %97 = vector.broadcast %cst_36 : f32 to vector<8x128xf32>
    %98 = arith.cmpf ogt, %23, %97 : vector<8x128xf32>
    %cst_37 = arith.constant 0.000000e+00 : f32
    %99 = vector.broadcast %cst_37 : f32 to vector<8x128xf32>
    %100 = arith.cmpf ogt, %19, %99 : vector<8x128xf32>
    %101 = arith.mulf %41, %23 : vector<8x128xf32>
    %cst_38 = arith.constant 6.000000e+00 : f32
    %102 = vector.broadcast %cst_38 : f32 to vector<8x128xf32>
    %103 = arith.subf %102, %101 : vector<8x128xf32>
    %104 = arith.select %100, %103, %3 : vector<8x128xi1>, vector<8x128xf32>
    %105 = arith.select %98, %104, %3 : vector<8x128xi1>, vector<8x128xf32>
    %106 = arith.mulf %19, %70 : vector<8x128xf32>
    %107 = arith.addf %106, %105 : vector<8x128xf32>
    %108 = arith.mulf %23, %79 : vector<8x128xf32>
    %109 = arith.addf %108, %96 : vector<8x128xf32>
    %c0_39 = arith.constant 0 : index
    %c0_40 = arith.constant 0 : index
    %110 = vector.load %arg3[%c0_39, %c0_40] : memref<8x128xf32, #tpu.memory_space<vmem>>, vector<8x128xf32>
    tpu.vector_store %arg3[%c0_39, %c0_40], %107 {strides = array<i32>} : memref<8x128xf32, #tpu.memory_space<vmem>>, vector<8x128xf32>,
    %c0_41 = arith.constant 0 : index
    %c0_42 = arith.constant 0 : index
    %111 = vector.load %arg4[%c0_41, %c0_42] : memref<8x128xf32, #tpu.memory_space<vmem>>, vector<8x128xf32>
    tpu.vector_store %arg4[%c0_41, %c0_42], %109 {strides = array<i32>} : memref<8x128xf32, #tpu.memory_space<vmem>>, vector<8x128xf32>,
    return
  }
  func.func @transform_0(%arg0: i32) -> (i32, i32) {
    %c0_i32 = arith.constant 0 : i32
    %c0_i32_0 = arith.constant 0 : i32
    return %arg0, %c0_i32 : i32, i32
  }
  func.func @transform_1(%arg0: i32) -> (i32, i32) {
    %c0_i32 = arith.constant 0 : i32
    %c0_i32_0 = arith.constant 0 : i32
    return %arg0, %c0_i32 : i32, i32
  }
  func.func @transform_2(%arg0: i32) -> (i32, i32) {
    %c0_i32 = arith.constant 0 : i32
    %c0_i32_0 = arith.constant 0 : i32
    return %arg0, %c0_i32 : i32, i32
  }
  func.func @transform_3(%arg0: i32) -> (i32, i32) {
    %c0_i32 = arith.constant 0 : i32
    %c0_i32_0 = arith.constant 0 : i32
    return %arg0, %c0_i32 : i32, i32
  }
}

</mosaic_0001>

<bundles_post_ra>
// kernel: verify_skip_path_forward.1
= control target key start
LH: loop header
LB: loop body
LE: loop exit
PB: predicated region body
PF: predicated region fallthrough
CT: control target
= control target key end

     0   :  { %s141_s0 = inlined_call_operand.vmem [shape: f32[16,128], index: 0, kind: input, shape index: {}, may-alias: {0,2}]   ;;  %s142_s1 = inlined_call_operand.vmem [shape: f32[16,128], index: 1, kind: input, shape index: {}, may-alias: {1,3}]   ;;  %s143_s2 = inlined_call_operand.vmem [shape: f32[16,128], index: 2, kind: output, shape index: {0}, may-alias: {0,2}]   ;;  %s144_s3 = inlined_call_operand.vmem [shape: f32[16,128], index: 3, kind: output, shape index: {1}, may-alias: {1,3}]  }
   0x1   :  { %v13_v0 = vld [vmem:[%s141_s0] sm:$0xff] }
   0x2   :  { %v14_v1 = vld [vmem:[%s142_s1] sm:$0xff]  ;;  %v23_v3 = vsub.f32 0.0, %v13_v0  ;;  %vm27_vm4 = vcmp.gt.f32.partialorder %v13_v0, 0.0 }
   0x3   :  { %v15_v2 = vsub.f32 %v14_v1, %v13_v0  ;;  %vm22_vm0 = vcmp.ge.f32.partialorder %v14_v1, 0.0 }
   0x4   :  { %vm24_vm2 = vcmp.gt.f32.partialorder %v14_v1, %v23_v3 }
   0x5   :  { %vm16_vm1 = vcmp.eq.f32.partialorder %v15_v2, 0.0  ;;  %vm25_vm3 = vmand %vm22_vm0, %vm24_vm2 }
   0x6   :  { %v17_v4 = vsel %vm16_vm1, 1.0, %v15_v2  ;;  %v26_v5 = vsel %vm25_vm3, %v13_v0, 0.0 }
   0x7   :  { %92 = vrcp.f32 %v17_v4  ;;  %v38_v6 = vsub.f32 6.0, %v26_v5  ;;  %v49_v19 = vsub.f32 0.0, %v26_v5  ;;  %vm62_vm9 = vcmp.gt.f32.partialorder %v26_v5, 6.0 }
   0x8   :  { %vm55_vm10 = vcmp.gt.f32.partialorder %v26_v5, 0.0 }
   0x9   :  { %94 = vrcp.f32 %v38_v6 }
  0x11   :  { %v93_v7 = vpop.eup %92 }
  0x12   :  { %v20_v8 = vmul.f32 %v93_v7, %v14_v1 }
  0x13   :  { %v95_v12 = vpop.eup %94 }
  0x14   :  { %v21_v9 = vmax.f32 %v20_v8, 0.0  ;;  %v47_v15 = vmul.f32 6.0, %v95_v12 }
  0x16   :  { %v28_v10 = vmul.f32 %v21_v9, %v15_v2  ;;  %v48_v17 = vmin.f32 %v47_v15, 1.0 }
  0x18   :  { %v29_v11 = vsel %vm27_vm4, %v14_v1, %v28_v10 }
  0x19   :  { %v30_v13 = vsub.f32 %v29_v11, %v26_v5  ;;  %96 = vrcp.f32 %v29_v11  ;;  %v91_v16 = vadd.f32 -6.0, %v29_v11  ;;  %vm50_vm7 = vcmp.gt.f32.partialorder %v29_v11, %v49_v19 }
  0x1a   :  { %vm58_vm8 = vcmp.lt.f32.partialorder %v29_v11, 0.0  ;;  %vm56_vm11 = vcmp.lt.f32.partialorder %v29_v11, 6.0  ;;  %vm72_vm12 = vcmp.gt.f32.partialorder %v29_v11, 6.0 }
  0x1b   :  { %vm31_vm5 = vcmp.eq.f32.partialorder %v30_v13, 0.0  ;;  %vm53_vm6 = vcmp.gt.f32.partialorder %v38_v6, %v91_v16 }
  0x1c   :  { %v32_v14 = vsel %vm31_vm5, 1.0, %v30_v13  ;;  %v54_v21 = vsel %vm53_vm6, %v48_v17, 0.0 }
  0x1d   :  { %98 = vrcp.f32 %v32_v14  ;;  %v68_v24 = vsub.f32 1.0, %v54_v21  ;;  %v63_v35 = vsel %vm62_vm9, 0.0, %v54_v21 }
  0x1f   :  { %v69_v31 = vmul.f32 6.0, %v68_v24 }
  0x21   :  { %v70_v42 = vsel %vm62_vm9, 6.0, %v69_v31 }
  0x23   :  { %v97_v18 = vpop.eup %96 }
  0x24   :  { %v43_v20 = vmul.f32 6.0, %v97_v18 }
  0x26   :  { %v44_v22 = vmax.f32 %v43_v20, 0.0 }
  0x27   :  { %v99_v23 = vpop.eup %98 }
  0x28   :  { %v39_v25 = vmul.f32 %v99_v23, %v38_v6  ;;  %v45_v26 = vmin.f32 %v44_v22, 1.0  ;;  %v35_v27 = vmul.f32 %v99_v23, %v29_v11 }
  0x2a   :  { %v40_v28 = vmax.f32 %v39_v25, 0.0  ;;  %v51_v29 = vsel %vm50_vm7, %v45_v26, 0.0  ;;  %v36_v30 = vmax.f32 %v35_v27, 0.0 }
  0x2b   :  { %v59_v33 = vsel %vm58_vm8, 0.0, %v51_v29 }
  0x2c   :  { %v41_v32 = vmin.f32 %v40_v28, 1.0  ;;  %v37_v34 = vmin.f32 %v36_v30, 1.0 }
  0x2e   :  { %v57_v36 = vsel %vm56_vm11, 1.0, %v41_v32  ;;  %v73_v37 = vmul.f32 %v41_v32, %v29_v11  ;;  %v61_v38 = vsel %vm55_vm10, 1.0, %v37_v34  ;;  %v65_v39 = vmul.f32 %v37_v34, %v26_v5 }
  0x2f   :  { %v60_v40 = vsel %vm55_vm10, %v57_v36, %v59_v33  ;;  %v64_v41 = vsel %vm56_vm11, %v61_v38, %v63_v35 }
  0x30   :  { %v74_v43 = vsub.f32 6.0, %v73_v37  ;;  %v77_v44 = vmul.f32 %v60_v40, %v26_v5  ;;  %v66_v45 = vsub.f32 0.0, %v65_v39  ;;  %v79_v46 = vmul.f32 %v64_v41, %v29_v11 }
  0x32   :  { %v75_v47 = vsel %vm55_vm10, %v74_v43, 0.0  ;;  %v67_v48 = vsel %vm55_vm10, 0.0, %v66_v45 }
  0x33   :  { %v76_v49 = vsel %vm72_vm12, %v75_v47, 0.0  ;;  %v71_v50 = vsel %vm56_vm11, %v67_v48, %v70_v42 }
  0x34   :  { %v78_v51 = vadd.f32 %v77_v44, %v76_v49  ;;  %v80_v52 = vadd.f32 %v79_v46, %v71_v50 }
  0x36   :  { %81 = vst [vmem:[%s143_s2] sm:$0xff] %v78_v51  ;;  %82 = vst [vmem:[%s144_s3] sm:$0xff] %v80_v52 }

</bundles_post_ra>
